<compile_context>
chip_gen: v7x
topology: tpu7x:2x2x1
jax: 0.10.0
libtpu: 0.0.40
codegen_flags: <defaults>
</compile_context>

<pallas_src>
import jax
import jax.numpy as jnp
from jax import lax
from jax.experimental import pallas as pl
from jax.experimental.pallas import tpu as pltpu

_CHUNK = 512                 # rows of compute per inner-loop step
_VMEM_BUDGET = 24 << 20      # target for live VMEM (headroom under the limit below)
_VMEM_LIMIT = 32 << 20       # explicit scoped-VMEM limit: raises v5e's 16 MiB default,
                             # equals the v6e/v7x default, well under v7x's 64 MiB physical


def _self_attention_kernel(x_ref, w1b_ref, b1t_ref, w2b_ref, mexp_ref, o_ref):
    bt, _ = x_ref.shape
    ch = min(bt, _CHUNK)          # wrapper guarantees bt % ch == 0
    nch = bt // ch

    w1b = w1b_ref[...]            # (S*D, S*H) block-diagonal linear1 weight
    b1t = b1t_ref[...]            # (1, S*H)   tiled linear1 bias
    w2b = w2b_ref[...]            # (S*H, S)   block-diagonal linear2 weight (b2 cancels)
    mexp = mexp_ref[...]          # (S, S*D)   expands per-seq attn back to the slab

    def body(c, carry):
        r0 = pl.multiple_of(c * ch, ch)
        x = x_ref[pl.ds(r0, ch), :]                                     # (ch, S*D)
        h = jnp.tanh(jnp.dot(x, w1b, preferred_element_type=jnp.float32) + b1t)
        s = jnp.dot(h, w2b, preferred_element_type=jnp.float32)         # (ch, S)
        m = jnp.max(s, axis=-1, keepdims=True)
        e = jnp.exp(s - m)
        den = jnp.sum(e, axis=-1, keepdims=True)
        r = pl.reciprocal(den, approx=True)                             # EUP path
        r = r * (2.0 - den * r)                                         # Newton #1
        r = r * (2.0 - den * r)                                         # Newton #2 -> f32 exact
        attn = e * r                                                    # (ch, S)
        aw = jnp.dot(attn, mexp, preferred_element_type=jnp.float32)    # (ch, S*D)
        o_ref[pl.ds(r0, ch), :] = (x * aw).astype(o_ref.dtype)
        return carry

    lax.fori_loop(0, nch, body, 0)


def _vmem_estimate(bt, sd, sh, s):
    """Lane-dense VMEM accounting for one grid step (f32)."""
    ch = min(bt, _CHUNK)
    blocks = 2 * 2 * bt * sd * 4                        # double-buffered x and out blocks
    weights = 2 * (sd * sh + sh + sh * s + s * sd) * 4  # (worst case double-buffered)
    interm = ch * (2 * sd + sh + 6 * s + 8) * 4         # x chunk, aw, h, scores/e/attn/den/m
    return blocks + weights + interm


def _round_block(bt, B):
    """Clamp bt so (a) it is a legal sublane-tiled block and (b) the in-kernel
    chunk loop (ch = min(bt, _CHUNK)) covers it exactly."""
    bt = int(max(1, min(bt, B)))
    if bt >= B and (B <= _CHUNK or B % _CHUNK == 0):
        return B
    if bt >= _CHUNK:
        return (bt // _CHUNK) * _CHUNK
    if bt >= B:
        return B
    return max(8, (bt // 8) * 8)


def _pick_block_b(B, sd, sh, s):
    row_bytes = sd * 4
    bt = max(1, (4 << 20) // row_bytes)          # ~4 MiB of x per grid step
    # Keep >= 4 grid steps (>= 2 per v7x TensorCore) while each step still
    # moves >= ~1 MiB of x.
    if B * row_bytes >= (4 << 20):
        bt = min(bt, pl.cdiv(B, 4))
    # Respect the VMEM budget (no lane-padding waste in the slab layout).
    while bt > 8 and _vmem_estimate(bt, sd, sh, s) > _VMEM_BUDGET:
        bt //= 2
    return _round_block(bt, B)


def self_attention(x, w1, b1, w2, b2=None, *, block_b=None):
    """x: (B, S, D) f32; w1: (D, H); b1: (H,); w2: (H, 1); b2: (1,).

    Matches torch SelfAttention.forward with softmax over dim=1 (the S axis).
    b2 is accepted for nn.Linear(H, 1) interface parity but dropped since
    softmax(s + c) == softmax(s).  For the 2-D (B, D) inputs used inside
    CNNClassifier, pass x[:, None, :] (S == 1).
    """
    del b2
    B, S, D = x.shape
    H = w1.shape[1]
    SD, SH = S * D, S * H

    # Lane-dense view of x: (B, S*D).  Contiguous reshape -> free.
    x2d = x.reshape(B, SD)

    # Block-diagonal / tiled parameters so every matmul stays in the slab layout.
    eye_s = jnp.eye(S, dtype=jnp.float32)
    w1b = jnp.kron(eye_s, w1.astype(jnp.float32))                  # (S*D, S*H)
    b1t = jnp.tile(b1.astype(jnp.float32), S).reshape(1, SH)       # (1, S*H)
    w2b = jnp.kron(eye_s, w2.astype(jnp.float32).reshape(H, 1))    # (S*H, S)
    mexp = jnp.kron(eye_s, jnp.ones((1, D), dtype=jnp.float32))    # (S, S*D)

    if block_b is None:
        bt = _pick_block_b(B, SD, SH, S)
    else:
        bt = _round_block(block_b, B)
    num_blocks = pl.cdiv(B, bt)   # non-divisible B -> ragged last block (no padding copy)

    cost = pl.CostEstimate(
        flops=int(2 * B * SD * SH + 2 * B * SH * S + 2 * B * S * SD + 5 * B * SD),
        transcendentals=int(B * (SH + S)),
        bytes_accessed=int(4 * (2 * B * SD + SD * SH + SH + SH * S + S * SD)),
    )

    out2d = pl.pallas_call(
        _self_attention_kernel,
        out_shape=jax.ShapeDtypeStruct((B, SD), x.dtype),
        grid_spec=pltpu.PrefetchScalarGridSpec(
            num_scalar_prefetch=0,
            grid=(num_blocks,),
            in_specs=[
                pl.BlockSpec((bt, SD), lambda b: (b, 0)),     # x slab
                pl.BlockSpec((SD, SH), lambda b: (0, 0)),     # kron(I_S, W1)
                pl.BlockSpec((1, SH), lambda b: (0, 0)),      # tiled b1
                pl.BlockSpec((SH, S), lambda b: (0, 0)),      # kron(I_S, w2)
                pl.BlockSpec((S, SD), lambda b: (0, 0)),      # kron(I_S, 1_{1xD})
            ],
            out_specs=pl.BlockSpec((bt, SD), lambda b: (b, 0)),
        ),
        compiler_params=pltpu.CompilerParams(
            dimension_semantics=("parallel",),
            vmem_limit_bytes=_VMEM_LIMIT,
        ),
        cost_estimate=cost,
    )(x2d, w1b, b1t, w2b, mexp)

    return out2d.reshape(B, S, D)


def _reference(x, w1, b1, w2, b2):
    h = jnp.tanh(jnp.einsum("bsd,dh->bsh", x, w1) + b1)
    s = jnp.einsum("bsh,ho->bso", h, w2) + b2              # (B, S, 1)
    attn = jax.nn.softmax(s, axis=1)
    return x * attn


if __name__ == "__main__":
    def run_case(B, S, D, H, block_b=None, atol=2e-5):
        key = jax.random.PRNGKey(0)
        kx, kw1, kb1, kw2, kb2 = jax.random.split(key, 5)
        x = jax.random.normal(kx, (B, S, D), dtype=jnp.float32)
        # Synthetic parameters with nn.Linear(D, H) / nn.Linear(H, 1) shapes.
        w1 = jax.random.normal(kw1, (D, H), dtype=jnp.float32) * 0.1
        b1 = jax.random.normal(kb1, (H,), dtype=jnp.float32) * 0.1
        w2 = jax.random.normal(kw2, (H, 1), dtype=jnp.float32) * 0.1
        b2 = jax.random.normal(kb2, (1,), dtype=jnp.float32) * 0.1

        out = jax.block_until_ready(
            self_attention(x, w1, b1, w2, b2, block_b=block_b))
        ref = _reference(x, w1, b1, w2, b2)
        assert out.shape == (B, S, D)
        err = float(jnp.max(jnp.abs(out - ref)))
        assert err <= atol, f"max abs err {err}"

    # Tiny case (single block), S*D = 128 lane-dense slab.
    run_case(B=2, S=8, D=16, H=32)
    # Multi-step grid with a ragged last block (B not a multiple of the block):
    # exercises the no-padding-copy path (blocks at rows 0-47, 48-95, 96-143;
    # only 96-99 of the last one are valid and written).
    run_case(B=100, S=8, D=16, H=32, block_b=48)
    # Module-shaped use: attn_seq on a 2-D (B, 512) activation == S = 1.
    run_case(B=4, S=1, D=512, H=64)

    print("KERNEL_OK")
</pallas_src>

<mosaic_0001>
module attributes {stable_mosaic.version = 11 : i64} {
  func.func @_self_attention_kernel(%arg0: i32, %arg1: memref<2x128xf32, #tpu.memory_space<vmem>>, %arg2: memref<128x256xf32, #tpu.memory_space<vmem>>, %arg3: memref<1x256xf32, #tpu.memory_space<vmem>>, %arg4: memref<256x8xf32, #tpu.memory_space<vmem>>, %arg5: memref<8x128xf32, #tpu.memory_space<vmem>>, %arg6: memref<2x128xf32, #tpu.memory_space<vmem>>) attributes {dimension_semantics = [#tpu.dimension_semantics<parallel>], iteration_bounds = array<i64: 1>, scalar_prefetch = 0 : i64, scratch_operands = 0 : i64, tpu.core_type = #tpu.core_type<tc>, window_params = [{transform_indices = @transform_0, window_bounds = array<i64: 2, 128>}, {pipeline_mode = #tpu.pipeline_mode<synchronous>, transform_indices = @transform_1, window_bounds = array<i64: 128, 256>}, {pipeline_mode = #tpu.pipeline_mode<synchronous>, transform_indices = @transform_2, window_bounds = array<i64: 1, 256>}, {pipeline_mode = #tpu.pipeline_mode<synchronous>, transform_indices = @transform_3, window_bounds = array<i64: 256, 8>}, {pipeline_mode = #tpu.pipeline_mode<synchronous>, transform_indices = @transform_4, window_bounds = array<i64: 8, 128>}, {transform_indices = @transform_5, window_bounds = array<i64: 2, 128>}]} {
    %c0 = arith.constant 0 : index
    %c0_0 = arith.constant 0 : index
    %0 = vector.load %arg2[%c0, %c0_0] : memref<128x256xf32, #tpu.memory_space<vmem>>, vector<128x256xf32>
    %c0_1 = arith.constant 0 : index
    %c0_2 = arith.constant 0 : index
    %1 = vector.load %arg3[%c0_1, %c0_2] : memref<1x256xf32, #tpu.memory_space<vmem>>, vector<1x256xf32>
    %c0_3 = arith.constant 0 : index
    %c0_4 = arith.constant 0 : index
    %2 = vector.load %arg4[%c0_3, %c0_4] : memref<256x8xf32, #tpu.memory_space<vmem>>, vector<256x8xf32>
    %c0_5 = arith.constant 0 : index
    %c0_6 = arith.constant 0 : index
    %3 = vector.load %arg5[%c0_5, %c0_6] : memref<8x128xf32, #tpu.memory_space<vmem>>, vector<8x128xf32>
    %c0_i32 = arith.constant 0 : i32
    %c2_i32 = arith.constant 2 : i32
    %4 = arith.muli %c0_i32, %c2_i32 : i32
    %5 = tpu.assume_multiple %4, 2 : i32
    %6 = arith.index_cast %5 : i32 to index
    %c0_7 = arith.constant 0 : index
    %7 = vector.load %arg1[%6, %c0_7] : memref<2x128xf32, #tpu.memory_space<vmem>>, vector<2x128xf32>
    %cst = arith.constant dense<0.000000e+00> : vector<2x256xf32>
    %8 = tpu.matmul %7, %0, %cst {dimension_numbers = #tpu.dot_dimension_numbers<[1], [0], [0], [1], [0, 0, 1, 1], [], []>} : vector<2x128xf32>, vector<128x256xf32>, vector<2x256xf32> -> vector<2x256xf32>
    %9 = vector.broadcast %1 : vector<1x256xf32> to vector<2x256xf32>
    %10 = arith.addf %8, %9 : vector<2x256xf32>
    %11 = math.tanh %10 : vector<2x256xf32>
    %cst_8 = arith.constant dense<0.000000e+00> : vector<2x8xf32>
    %12 = tpu.matmul %11, %2, %cst_8 {dimension_numbers = #tpu.dot_dimension_numbers<[1], [0], [0], [1], [0, 0, 1, 1], [], []>} : vector<2x256xf32>, vector<256x8xf32>, vector<2x8xf32> -> vector<2x8xf32>
    %cst_9 = arith.constant dense<0xFF800000> : vector<2xf32>
    %13 = vector.multi_reduction <maximumf>, %12, %cst_9 [1] : vector<2x8xf32> to vector<2xf32>
    %14 = vector.shape_cast %13 : vector<2xf32> to vector<2x1xf32>
    %15 = vector.broadcast %14 : vector<2x1xf32> to vector<2x8xf32>
    %16 = arith.subf %12, %15 : vector<2x8xf32>
    %17 = math.exp %16 : vector<2x8xf32>
    %cst_10 = arith.constant dense<0.000000e+00> : vector<2xf32>
    %18 = vector.multi_reduction <add>, %17, %cst_10 [1] : vector<2x8xf32> to vector<2xf32>
    %19 = vector.shape_cast %18 : vector<2xf32> to vector<2x1xf32>
    %20 = tpu.reciprocal %19 {approx = true} : vector<2x1xf32> -> vector<2x1xf32>
    %21 = arith.mulf %19, %20 : vector<2x1xf32>
    %cst_11 = arith.constant 2.000000e+00 : f32
    %22 = vector.broadcast %cst_11 : f32 to vector<2x1xf32>
    %23 = arith.subf %22, %21 : vector<2x1xf32>
    %24 = arith.mulf %20, %23 : vector<2x1xf32>
    %25 = arith.mulf %19, %24 : vector<2x1xf32>
    %cst_12 = arith.constant 2.000000e+00 : f32
    %26 = vector.broadcast %cst_12 : f32 to vector<2x1xf32>
    %27 = arith.subf %26, %25 : vector<2x1xf32>
    %28 = arith.mulf %24, %27 : vector<2x1xf32>
    %29 = vector.broadcast %28 : vector<2x1xf32> to vector<2x8xf32>
    %30 = arith.mulf %17, %29 : vector<2x8xf32>
    %cst_13 = arith.constant dense<0.000000e+00> : vector<2x128xf32>
    %31 = tpu.matmul %30, %3, %cst_13 {dimension_numbers = #tpu.dot_dimension_numbers<[1], [0], [0], [1], [0, 0, 1, 1], [], []>} : vector<2x8xf32>, vector<8x128xf32>, vector<2x128xf32> -> vector<2x128xf32>
    %32 = arith.mulf %7, %31 : vector<2x128xf32>
    %33 = arith.index_cast %5 : i32 to index
    %c0_14 = arith.constant 0 : index
    %34 = vector.load %arg6[%33, %c0_14] : memref<2x128xf32, #tpu.memory_space<vmem>>, vector<2x128xf32>
    tpu.vector_store %arg6[%33, %c0_14], %32 {strides = array<i32>} : memref<2x128xf32, #tpu.memory_space<vmem>>, vector<2x128xf32>,
    %c1_i32 = arith.constant 1 : i32
    return
  }
  func.func @transform_0(%arg0: i32) -> (i32, i32) {
    %c0_i32 = arith.constant 0 : i32
    %c0_i32_0 = arith.constant 0 : i32
    return %arg0, %c0_i32 : i32, i32
  }
  func.func @transform_1(%arg0: i32) -> (i32, i32) {
    %c0_i32 = arith.constant 0 : i32
    %c0_i32_0 = arith.constant 0 : i32
    %c0_i32_1 = arith.constant 0 : i32
    return %c0_i32, %c0_i32_0 : i32, i32
  }
  func.func @transform_2(%arg0: i32) -> (i32, i32) {
    %c0_i32 = arith.constant 0 : i32
    %c0_i32_0 = arith.constant 0 : i32
    %c0_i32_1 = arith.constant 0 : i32
    return %c0_i32, %c0_i32_0 : i32, i32
  }
  func.func @transform_3(%arg0: i32) -> (i32, i32) {
    %c0_i32 = arith.constant 0 : i32
    %c0_i32_0 = arith.constant 0 : i32
    %c0_i32_1 = arith.constant 0 : i32
    return %c0_i32, %c0_i32_0 : i32, i32
  }
  func.func @transform_4(%arg0: i32) -> (i32, i32) {
    %c0_i32 = arith.constant 0 : i32
    %c0_i32_0 = arith.constant 0 : i32
    %c0_i32_1 = arith.constant 0 : i32
    return %c0_i32, %c0_i32_0 : i32, i32
  }
  func.func @transform_5(%arg0: i32) -> (i32, i32) {
    %c0_i32 = arith.constant 0 : i32
    %c0_i32_0 = arith.constant 0 : i32
    return %arg0, %c0_i32 : i32, i32
  }
}

</mosaic_0001>

<bundles_post_ra>
// kernel: tpu_custom_call.1
= control target key start
LH: loop header
LB: loop body
LE: loop exit
PB: predicated region body
PF: predicated region fallthrough
CT: control target
= control target key end

     0   :  { %v492_v7 = vmov 0.0   ;;  %s745_s0 = inlined_call_operand.vmem [shape: f32[2,128], index: 0, kind: input, shape index: {}]   ;;  %s746_s1 = inlined_call_operand.vmem [shape: f32[128,256], index: 1, kind: input, shape index: {}]   ;;  %s747_s2 = inlined_call_operand.vmem [shape: f32[1,256], index: 2, kind: input, shape index: {}]   ;;  %s748_s3 = inlined_call_operand.vmem [shape: f32[256,8], index: 3, kind: input, shape index: {}]   ;;  %s749_s4 = inlined_call_operand.vmem [shape: f32[8,128], index: 4, kind: input, shape index: {}]   ;;  %s750_s5 = inlined_call_operand.hbm [shape: f32[2,128], index: 5, kind: output, shape index: {}]  }
   0x1   :  { %v22_v0 = vld [vmem:[%s746_s1 + $0x8] sm:$0xff]  ;;  %v24_v1 = vld [vmem:[%s746_s1 + $0x18] sm:$0xff]  ;;  %v21_v2 = vld [vmem:[%s746_s1] sm:$0xff]  ;;  %163 = vmatprep.mubr.f32.mxu0 %v492_v7 }
   0x2   :  { %v393_v3 = vpack.c.bf16 %v24_v1, %v22_v0  ;;  %v23_v4 = vld [vmem:[%s746_s1 + $0x10] sm:$0xff]  ;;  %v26_v5 = vld [vmem:[%s746_s1 + $0x28] sm:$0xff]  ;;  %v28_v6 = vld [vmem:[%s746_s1 + $0x38] sm:$0xff] }
   0x3   :  { %v395_v8 = vpack.c.bf16 %v23_v4, %v21_v2  ;;  %v397_v9 = vpack.c.bf16 %v28_v6, %v26_v5  ;;  %v25_v10 = vld [vmem:[%s746_s1 + $0x20] sm:$0xff]  ;;  %v27_v11 = vld [vmem:[%s746_s1 + $0x30] sm:$0xff]  ;;  %v30_v12 = vld [vmem:[%s746_s1 + $0x48] sm:$0xff] }
   0x4   :  { %394 = vmatprep.subr.bf16.mxu0 %v393_v3  ;;  %v32_v13 = vld [vmem:[%s746_s1 + $0x58] sm:$0xff]  ;;  %v399_v14 = vpack.c.bf16 %v27_v11, %v25_v10  ;;  %v29_v16 = vld [vmem:[%s746_s1 + $0x40] sm:$0xff]  ;;  %v31_v17 = vld [vmem:[%s746_s1 + $0x50] sm:$0xff] }
   0x5   :  { %396 = vmatpush1.bf16.msra.mxu0 %v395_v8  ;;  %v401_v15 = vpack.c.bf16 %v32_v13, %v30_v12  ;;  %v34_v18 = vld [vmem:[%s746_s1 + $0x68] sm:$0xff]  ;;  %v36_v19 = vld [vmem:[%s746_s1 + $0x78] sm:$0xff]  ;;  %v403_v20 = vpack.c.bf16 %v31_v17, %v29_v16  ;;  %v33_v22 = vld [vmem:[%s746_s1 + $0x60] sm:$0xff] }
   0x6   :  { %398 = vmatprep.subr.bf16.mxu0 %v397_v9  ;;  %v405_v21 = vpack.c.bf16 %v36_v19, %v34_v18  ;;  %v35_v23 = vld [vmem:[%s746_s1 + $0x70] sm:$0xff]  ;;  %v38_v24 = vld [vmem:[%s746_s1 + $0x88] sm:$0xff]  ;;  %v40_v25 = vld [vmem:[%s746_s1 + $0x98] sm:$0xff] }
   0x7   :  { %v37_v26 = vld [vmem:[%s746_s1 + $0x80] sm:$0xff]  ;;  %v39_v27 = vld [vmem:[%s746_s1 + $0x90] sm:$0xff]  ;;  %v71_v29 = vld [vmem:[%s748_s3 + $0x88] sm:$0xff]  ;;  %v407_v31 = vpack.c.bf16 %v35_v23, %v33_v22  ;;  %v409_v36 = vpack.c.bf16 %v40_v25, %v38_v24 }
   0x8   :  { %v70_v28 = vld [vmem:[%s748_s3 + $0x80] sm:$0xff]  ;;  %v55_v33 = vld [vmem:[%s748_s3 + $0x8] sm:$0xff]  ;;  %v72_v34 = vld [vmem:[%s748_s3 + $0x90] sm:$0xff]  ;;  %v411_v47 = vpack.c.bf16 %v39_v27, %v37_v26 }
   0x9   :  { %400 = vmatpush1.bf16.msra.mxu0 %v399_v14  ;;  %v54_v30 = vld [vmem:[%s748_s3] sm:$0xff]  ;;  %v425_v32 = vpack.c.bf16 %v71_v29, %v70_v28  ;;  %v73_v35 = vld [vmem:[%s748_s3 + $0x98] sm:$0xff]  ;;  %v56_v39 = vld [vmem:[%s748_s3 + $0x10] sm:$0xff] }
   0xa   :  { %402 = vmatprep.subr.bf16.mxu0 %v401_v15  ;;  %v427_v37 = vpack.c.bf16 %v55_v33, %v54_v30  ;;  %v429_v38 = vpack.c.bf16 %v73_v35, %v72_v34  ;;  %v57_v40 = vld [vmem:[%s748_s3 + $0x18] sm:$0xff]  ;;  %v74_v41 = vld [vmem:[%s748_s3 + $0xa0] sm:$0xff]  ;;  %v42_v42 = vld [vmem:[%s746_s1 + $0xa8] sm:$0xff] }
   0xb   :  { %v44_v43 = vld [vmem:[%s746_s1 + $0xb8] sm:$0xff]  ;;  %426 = vmatprep.subr.bf16.mxu1 %v425_v32  ;;  %v75_v44 = vld [vmem:[%s748_s3 + $0xa8] sm:$0xff]  ;;  %v41_v45 = vld [vmem:[%s746_s1 + $0xa0] sm:$0xff]  ;;  %v431_v46 = vpack.c.bf16 %v57_v40, %v56_v39 }
   0xc   :  { %428 = vmatpush3.bf16.msra.mxu1 %v427_v37  ;;  %v433_v48 = vpack.c.bf16 %v75_v44, %v74_v41  ;;  %v58_v49 = vld [vmem:[%s748_s3 + $0x20] sm:$0xff]  ;;  %v59_v50 = vld [vmem:[%s748_s3 + $0x28] sm:$0xff] }
   0xd   :  { %404 = vmatpush1.bf16.msra.mxu0 %v403_v20  ;;  %430 = vmatprep.subr.bf16.mxu1 %v429_v38 }
   0xe   :  { %406 = vmatprep.subr.bf16.mxu0 %v405_v21 }
  0x11   :  { %408 = vmatpush1.bf16.msra.mxu0 %v407_v31 }
  0x12   :  { %10 = vsyncpa [#allocation3], 0  ;;  %410 = vmatprep.subr.bf16.mxu0 %v409_v36  ;;  %v413_v51 = vpack.c.bf16 %v44_v43, %v42_v42  ;;  %v43_v52 = vld [vmem:[%s746_s1 + $0xb0] sm:$0xff]  ;;  %v77_v54 = vld [vmem:[%s748_s3 + $0xb8] sm:$0xff]  ;;  %432 = vmatpush3.bf16.msra.mxu1 %v431_v46  ;;  %v435_v57 = vpack.c.bf16 %v59_v50, %v58_v49  ;;  %v89_v35 = vlaneseq  ;;  %vm242_vm0 = vcmask 58368  }
  0x13   :  { %v76_v53 = vld [vmem:[%s748_s3 + $0xb0] sm:$0xff]  ;;  %v46_v55 = vld [vmem:[%s746_s1 + $0xc8] sm:$0xff]  ;;  %v48_v56 = vld [vmem:[%s746_s1 + $0xd8] sm:$0xff]  ;;  %v415_v58 = vpack.c.bf16 %v43_v52, %v41_v45  ;;  %434 = vmatprep.subr.bf16.mxu1 %v433_v48  ;;  %vm493_vm1 = vmmov 0   ;;  %vm260_vm2 = vcmask 64512  }
  0x14   :  { %v437_v59 = vpack.c.bf16 %v77_v54, %v76_v53  ;;  %v60_v60 = vld [vmem:[%s748_s3 + $0x30] sm:$0xff]  ;;  %v61_v61 = vld [vmem:[%s748_s3 + $0x38] sm:$0xff]  ;;  %v417_v62 = vpack.c.bf16 %v48_v56, %v46_v55  ;;  %v45_v63 = vld [vmem:[%s746_s1 + $0xc0] sm:$0xff]  ;;  %v90_v36 = vshrl.u32 %v89_v35, 7 }
  0x15   :  { %412 = vmatpush1.bf16.msra.mxu0 %v411_v47  ;;  %v47_v0 = vld [vmem:[%s746_s1 + $0xd0] sm:$0xff]  ;;  %v50_v1 = vld [vmem:[%s746_s1 + $0xe8] sm:$0xff]  ;;  %v52_v2 = vld [vmem:[%s746_s1 + $0xf8] sm:$0xff]  ;;  %v439_v3 = vpack.c.bf16 %v61_v61, %v60_v60 }
  0x16   :  { %414 = vmatprep.subr.bf16.mxu0 %v413_v51  ;;  %436 = vmatpush3.bf16.msra.mxu1 %v435_v57  ;;  %v419_v4 = vpack.c.bf16 %v47_v0, %v45_v63  ;;  %v421_v5 = vpack.c.bf16 %v52_v2, %v50_v1  ;;  %v49_v6 = vld [vmem:[%s746_s1 + $0xe0] sm:$0xff]  ;;  %v51_v8 = vld [vmem:[%s746_s1 + $0xf0] sm:$0xff]  ;;  %v79_v12 = vld [vmem:[%s748_s3 + $0xc8] sm:$0xff]  ;;  %v91_v37 = vsub.s32 0, %v90_v36  ;;  %v95_v39 = vsub.s32 1, %v90_v36 }
  0x17   :  { %438 = vmatprep.subr.bf16.mxu1 %v437_v59  ;;  %v423_v9 = vpack.c.bf16 %v51_v8, %v49_v6  ;;  %v673_v10 = vld [vmem:[%s745_s0] sm:$0x3]  ;;  %v63_v15 = vld [vmem:[%s748_s3 + $0x48] sm:$0xff]  ;;  %v80_v17 = vld [vmem:[%s748_s3 + $0xd0] sm:$0xff]  ;;  %s494_s0 = smov [#allocation2]  }
  0x18   :  { %v78_v11 = vld [vmem:[%s748_s3 + $0xc0] sm:$0xff]  ;;  %v81_v18 = vld [vmem:[%s748_s3 + $0xd8] sm:$0xff]  ;;  %v64_v20 = vld [vmem:[%s748_s3 + $0x50] sm:$0xff]  ;;  %s342_s22 = sshll.u32 %s494_s0, 4  ;;  %s343_s22 = int_to_ptr.vmem [resolvable:$true] %s342_s22 }
  0x19   :  { %416 = vmatpush1.bf16.msra.mxu0 %v415_v58  ;;  %v441_v13 = vpack.c.bf16 %v79_v12, %v78_v11  ;;  %v62_v14 = vld [vmem:[%s748_s3 + $0x40] sm:$0xff]  ;;  %v445_v19 = vpack.c.bf16 %v81_v18, %v80_v17  ;;  %v65_v21 = vld [vmem:[%s748_s3 + $0x58] sm:$0xff]  ;;  %v83_v24 = vld [vmem:[%s748_s3 + $0xe8] sm:$0xff]  ;;  %p473_p1 = scmp.lt.s32.totalorder %s343_s22, %s343_s22 }
  0x1a   :  { %418 = vmatprep.subr.bf16.mxu0 %v417_v62  ;;  %440 = vmatpush3.bf16.msra.mxu1 %v439_v3  ;;  %v443_v16 = vpack.c.bf16 %v63_v15, %v62_v14  ;;  %v447_v22 = vpack.c.bf16 %v65_v21, %v64_v20  ;;  %v82_v23 = vld [vmem:[%s748_s3 + $0xe0] sm:$0xff]  ;;  %v67_v27 = vld [vmem:[%s748_s3 + $0x68] sm:$0xff]  ;;  %v84_v28 = vld [vmem:[%s748_s3 + $0xf0] sm:$0xff] }
  0x1b   :  { %442 = vmatprep.subr.bf16.mxu1 %v441_v13  ;;  %v66_v25 = vld [vmem:[%s748_s3 + $0x60] sm:$0xff]  ;;  %v449_v26 = vpack.c.bf16 %v83_v24, %v82_v23  ;;  %v85_v29 = vld [vmem:[%s748_s3 + $0xf8] sm:$0xff]  ;;  %v68_v32 = vld [vmem:[%s748_s3 + $0x70] sm:$0xff] }
  0x1c   :  { %v451_v30 = vpack.c.bf16 %v67_v27, %v66_v25  ;;  %v453_v31 = vpack.c.bf16 %v85_v29, %v84_v28  ;;  %v69_v33 = vld [vmem:[%s748_s3 + $0x78] sm:$0xff]  ;;  %v53_v38 = vld [vmem:[%s747_s2] sm:$0x3] }
  0x1d   :  { %420 = vmatpush1.bf16.msra.mxu0 %v419_v4  ;;  %v455_v34 = vpack.c.bf16 %v69_v33, %v68_v32  ;;  %v92_v40 = vrot.slane %v53_v38, %v91_v37  ;;  %v96_v41 = vrot.slane %v53_v38, %v95_v39  ;;  %v86_v57 = vld [vmem:[%s749_s4] sm:$0xff]  ;;  %s468_s4 = scalar_lea.vmem %s343_s22, 32 }
  0x1e   :  { %422 = vmatprep.subr.bf16.mxu0 %v421_v5  ;;  %444 = vmatpush3.bf16.msra.mxu1 %v443_v16  ;;  %p469_p0 = scmp.ne.s32.totalorder %s343_s22, %s468_s4  ;;  %p474_p2 = scmp.lt.s32.totalorder %s468_s4, %s468_s4 }
  0x1f   :  { %446 = vmatprep.subr.bf16.mxu1 %v445_v19 }
  0x20   :  { %p475_p3 = por %p474_p2, %p473_p1 }
  0x21   :  { %424 = vmatpush1.bf16.msra.mxu0 %v423_v9 }
  0x22   :  { %388 = vmatprep.subr.mxu0 %v492_v7  ;;  %448 = vmatpush3.bf16.msra.mxu1 %v447_v22  ;;  %p476_p4 = pnand %p475_p3, %p469_p0 }
  0x23   :  { %450 = vmatprep.subr.bf16.mxu1 %v449_v26 }
  0x24   :  { %164 = vmatmul.mubr.f32.vlgmr.msra.gmra.mrb[0].mxu0 %v673_v10 }
  0x25   :  { %389 = vmatpush3.msra.mxu0 %v86_v57  ;;  %390 = vmatprep.mubr.msk.f32.mxu0 %vm493_vm1, %v492_v7 }
  0x26   :  { %452 = vmatpush3.bf16.msra.mxu1 %v451_v30 }
  0x27   :  { %454 = vmatprep.subr.bf16.mxu1 %v453_v31 }
  0x2a   :  { %456 = vmatpush3.bf16.msra.mxu1 %v455_v34 }
  0xf7   :  { %v165_v42 = vpop.f32.mrb[0].mxu0 }
  0xf8   :  { %v166_v43 = vadd.f32 %v165_v42, %v92_v40  ;;  %v167_v44 = vpop.f32.mrb[1].mxu0 }
  0xf9   :  { %v168_v45 = vadd.f32 %v167_v44, %v96_v41 }
  0xfb   :  { %460 = vtanh.f32 %v168_v45 }
  0xfc   :  { %462 = vtanh.f32 %v166_v43 }
 0x105   :  { %v461_v46 = vpop.eup %460 }
 0x106   :  { %v463_v47 = vpop.eup %462  ;;  %236 = vmatprep.mubr.f32.mxu1 %v461_v46 }
 0x107   :  { %237 = vmatmul.mubr.f32.vlgmr.msra.gmra.mrb[0].mxu1 %v463_v47 }
 0x1da   :  { %v383_v48 = vpop.f32.mrb[0].mxu1 }
 0x1db   :  { %v384_v49 = vpop.f32.mrb[1].mxu1 }
 0x1dc   :  { %v385_v50 = vadd.f32 %v384_v49, %v383_v48 }
 0x1de   :  { %v243_v51 = vsel %vm242_vm0, %v385_v50, -inf }
 0x1df   :  { %244 = vmax.xlane.f32.xlu0 %v243_v51 }
 0x26c   :  { %v245_v52 = vpop.xlane.xlu0 %244 }
 0x26d   :  { %v246_v53 = vsub.f32 %v385_v50, %v245_v52 }
 0x26f   :  { %v247_v54 = vmul.f32 1.442695, %v246_v53 }
 0x271   :  { %464 = vpow2.f32 %v247_v54 }
 0x27b   :  { %v465_v55 = vpop.eup %464 }
 0x27c   :  { %v249_v56 = vsel %vm242_vm0, %v465_v55, 0.0 }
 0x27d   :  { %250 = vadd.xlane.f32.xlu0 %v249_v56 }
 0x30a   :  { %v251_v58 = vpop.xlane.xlu0 %250 }
 0x30b   :  { %466 = vrcp.f32 %v251_v58 }
 0x315   :  { %v467_v59 = vpop.eup %466 }
 0x316   :  { %v253_v60 = vmul.f32 %v467_v59, %v251_v58 }
 0x318   :  { %v254_v61 = vsub.f32 2.0, %v253_v60 }
 0x31a   :  { %v255_v62 = vmul.f32 %v467_v59, %v254_v61 }
 0x31c   :  { %v256_v63 = vmul.f32 %v255_v62, %v251_v58 }
 0x31e   :  { %v257_v0 = vsub.f32 2.0, %v256_v63 }
 0x320   :  { %v258_v1 = vmul.f32 %v257_v0, %v255_v62 }
 0x322   :  { %v259_v2 = vmul.f32 %v465_v55, %v258_v1 }
 0x324   :  { %391 = vmatmul.mubr.msk.f32.vlgmr.msra.gmra.mrb[2].mxu0 %vm260_vm2, %v259_v2 }
 0x3f7   :  { %v330_v3 = vpop.f32.mrb[2].mxu0 }
 0x3f8   :  { %v334_v4 = vmul.f32 %v330_v3, %v673_v10  ;;  %v392_v5 = vpop.f32.mrb[3].mxu0 }
 0x3fa   :  { %335 = vst [vmem:[#allocation2] sm:$0x3] %v334_v4 }
 0x3fb   :  { %479 = shalt.err (!%p476_p4)
}
 0x3fc   :  { %s480_s25 = scalar_lea.hbm %s750_s5, 32 }
 0x3fd   :  { %p481_p5 = scmp.ne.s32.totalorder %s750_s5, %s480_s25  ;;  %p484_p6 = scmp.lt.u32.totalorder %s480_s25, %s750_s5 }
 0x3ff   :  { %p486_p7 = pnand %p484_p6, %p481_p5 }
 0x401   :  { %489 = shalt.err (!%p486_p7)
}
 0x402   :  { %345 = dma.vmem_to_hbm [thread:$0]  %s343_s22, 32, %s750_s5, [#allocation3]  }
 0x403   :  { %490 = dma.done.wait [#allocation3], 32  }
 0x404   :  { %491 = vsyncadd [#allocation3], 4294967264 }
 0x405   :  { %349 = vsyncpa [#allocation3], 1 }

</bundles_post_ra>
